<compile_context>
chip_gen: v7x
topology: tpu7x:2x2x1
jax: 0.10.0
libtpu: 0.0.40
codegen_flags: <defaults>
</compile_context>

<pallas_src>
import functools

import jax
import jax.numpy as jnp
from jax import lax
from jax.experimental import pallas as pl
from jax.experimental.pallas import tpu as pltpu

_LANE = 128
_VMEM_BLOCK_BUDGET = 16 * 1024 * 1024   # budget for 2x(in) + 2x(out) pipelined buffers
_VMEM_LIMIT_BYTES = 32 * 1024 * 1024    # scoped VMEM limit (>= v5e's 16 MiB default)
_TRAFFIC_PER_STEP = 4 * 1024 * 1024     # ~4 MiB HBM traffic per grid step is plenty
_MIN_GRID_STEPS = 8                     # keep megacore sharding + pipelining alive


def _layernorm_kernel(w_ref, b_ref, x_ref, o_ref, *, bias_free):
    # w_ref, b_ref : (C, 1)  f32 per-channel affine params (broadcast over lanes)
    # x_ref, o_ref : (C, BLK) one batch element x one lane-block of pixels, native dtype
    x = x_ref[...].astype(jnp.float32)                 # upcast inside the kernel
    mu = jnp.mean(x, axis=0, keepdims=True)            # (1, BLK) sublane reduce
    xc = x - mu
    var = jnp.mean(xc * xc, axis=0, keepdims=True)     # biased variance about the mean
    inv = lax.rsqrt(var + 1e-5)                        # EUP rsqrt (otherwise-idle slot)
    w = w_ref[...]                                     # (C, 1) -> broadcasts over lanes
    if bias_free:
        # BiasFree_LayerNorm: x / sqrt(var + eps) * weight
        y = x * inv * w
    else:
        # WithBias_LayerNorm: (x - mu) / sqrt(var + eps) * weight + bias
        y = xc * inv * w + b_ref[...]
    o_ref[...] = y.astype(o_ref.dtype)


def _pick_hw_block(hw, c, n, itemsize):
    """Lane-block size: multiple of 128, sized against VMEM / traffic / grid caps."""
    if hw <= _LANE:
        return hw                                       # full-extent block, always legal
    # In VMEM the channel dim is padded to a full sublane tile (8 f32 / 16 bf16 / 32 i8).
    sublane_tile = 8 * max(1, 4 // itemsize)
    padded_c = -(-c // sublane_tile) * sublane_tile
    # Cap 1: 2x(in) + 2x(out) double buffers within the VMEM block budget.
    blk = _VMEM_BLOCK_BUDGET // (4 * padded_c * itemsize)
    # Cap 2: a few MiB of HBM traffic (in + out) per step amortizes the ~0.35us
    # per-step pipeline overhead on all generations.
    blk = min(blk, _TRAFFIC_PER_STEP // (2 * c * itemsize))
    # Cap 3: keep >= _MIN_GRID_STEPS total grid steps (v7x megacore sharding and
    # DMA/compute overlap), but never below 1024 lanes of work per step.
    steps_per_batch = -(-_MIN_GRID_STEPS // n)
    blk = min(blk, max(8 * _LANE, -(-hw // steps_per_batch)))
    blk = max(_LANE, (blk // _LANE) * _LANE)
    if blk >= hw:
        return hw                                       # single full-extent block
    return blk


def layernorm_forward(x_nchw, weight, bias=None, layernorm_type="WithBias"):
    """Equivalent of LayerNorm(dim, LayerNorm_type).forward(x) for NCHW input."""
    N, C, H, W = x_nchw.shape
    HW = H * W
    blk = _pick_hw_block(HW, C, N, x_nchw.dtype.itemsize)
    bias_free = (layernorm_type == "BiasFree")

    # (N, C, H, W) -> (N, C, H*W): pure view reshape, no transpose.  Keep the
    # native dtype (the kernel upcasts internally) to avoid an extra HBM pass.
    x2 = x_nchw.reshape(N, C, HW)
    w2 = jnp.asarray(weight, jnp.float32).reshape(C, 1)
    if bias is None:
        bias = jnp.zeros((C,), jnp.float32)
    b2 = jnp.asarray(bias, jnp.float32).reshape(C, 1)

    kernel = functools.partial(_layernorm_kernel, bias_free=bias_free)

    out = pl.pallas_call(
        kernel,
        out_shape=jax.ShapeDtypeStruct((N, C, HW), x_nchw.dtype),
        grid_spec=pltpu.PrefetchScalarGridSpec(
            num_scalar_prefetch=0,
            grid=(N, pl.cdiv(HW, blk)),
            in_specs=[
                pl.BlockSpec((C, 1), lambda n, j: (0, 0)),             # weight (resident)
                pl.BlockSpec((C, 1), lambda n, j: (0, 0)),             # bias   (resident)
                pl.BlockSpec((None, C, blk), lambda n, j: (n, 0, j)),  # x
            ],
            out_specs=pl.BlockSpec((None, C, blk), lambda n, j: (n, 0, j)),
        ),
        compiler_params=pltpu.CompilerParams(
            dimension_semantics=("parallel", "parallel"),
            vmem_limit_bytes=_VMEM_LIMIT_BYTES),
    )(w2, b2, x2)

    return out.reshape(N, C, H, W)


def layernorm_reference(x_nchw, weight, bias, layernorm_type):
    """Pure-JAX reference matching the PyTorch module (to_3d -> LN(-1) -> to_4d)."""
    mu = jnp.mean(x_nchw, axis=1, keepdims=True)
    var = jnp.mean((x_nchw - mu) ** 2, axis=1, keepdims=True)   # unbiased=False
    inv = 1.0 / jnp.sqrt(var + 1e-5)
    w = weight.reshape(1, -1, 1, 1)
    if layernorm_type == "BiasFree":
        return x_nchw * inv * w
    return (x_nchw - mu) * inv * w + bias.reshape(1, -1, 1, 1)


if __name__ == "__main__":
    key = jax.random.PRNGKey(0)
    kx, kw, kb, ko = jax.random.split(key, 4)

    failures = []

    def check(x, weight, bias, ln_type, atol, rtol):
        out = jax.block_until_ready(layernorm_forward(x, weight, bias, ln_type))
        ref = layernorm_reference(x.astype(jnp.float32), weight, bias, ln_type)
        ref = ref.astype(x.dtype).astype(jnp.float32)
        out_f32 = out.astype(jnp.float32)
        if not jnp.allclose(out_f32, ref, atol=atol, rtol=rtol):
            err = float(jnp.max(jnp.abs(out_f32 - ref)))
            failures.append(f"MISMATCH {ln_type} {x.shape} {x.dtype}: max_err={err}")

    # Primary shape implied by the module test: batch=2, channels=4, spatial=16x16.
    N, C, H, W = 2, 4, 16, 16
    x = jax.random.normal(kx, (N, C, H, W), jnp.float32)
    # Module initializes weight=ones, bias=zeros; randomize so the affine path
    # is actually exercised.
    weight = 1.0 + 0.1 * jax.random.normal(kw, (C,), jnp.float32)
    bias = 0.1 * jax.random.normal(kb, (C,), jnp.float32)
    for ln_type in ("WithBias", "BiasFree"):
        check(x, weight, bias, ln_type, atol=1e-5, rtol=1e-5)

    # Non-128-multiple spatial extent -> cdiv grid with a masked partial last block.
    x_odd = jax.random.normal(ko, (1, 4, 48, 50), jnp.float32)
    check(x_odd, weight, bias, "WithBias", atol=1e-5, rtol=1e-5)

    # bf16 input -> native-dtype HBM traffic with in-kernel f32 upcast.
    check(x.astype(jnp.bfloat16), weight, bias, "WithBias", atol=2e-2, rtol=2e-2)

    if failures:
        for msg in failures:
            print(msg)
    else:
        print("KERNEL_OK")
</pallas_src>

<mosaic_0001>
module attributes {stable_mosaic.version = 11 : i64} {
  func.func @_layernorm_kernel(%arg0: i32, %arg1: i32, %arg2: memref<4x1xf32, #tpu.memory_space<vmem>>, %arg3: memref<4x1xf32, #tpu.memory_space<vmem>>, %arg4: memref<1x4x256xf32, #tpu.memory_space<vmem>>, %arg5: memref<1x4x256xf32, #tpu.memory_space<vmem>>) attributes {dimension_semantics = [#tpu.dimension_semantics<parallel>, #tpu.dimension_semantics<parallel>], iteration_bounds = array<i64: 2, 1>, scalar_prefetch = 0 : i64, scratch_operands = 0 : i64, tpu.core_type = #tpu.core_type<tc>, window_params = [{pipeline_mode = #tpu.pipeline_mode<synchronous>, transform_indices = @transform_0, window_bounds = array<i64: 4, 1>}, {pipeline_mode = #tpu.pipeline_mode<synchronous>, transform_indices = @transform_1, window_bounds = array<i64: 4, 1>}, {transform_indices = @transform_2, window_bounds = array<i64: 1, 4, 256>}, {transform_indices = @transform_3, window_bounds = array<i64: 1, 4, 256>}]} {
    %c0 = arith.constant 0 : index
    %c0_0 = arith.constant 0 : index
    %c0_1 = arith.constant 0 : index
    %0 = vector.load %arg4[%c0, %c0_0, %c0_1] : memref<1x4x256xf32, #tpu.memory_space<vmem>>, vector<1x4x256xf32>
    %1 = vector.shape_cast %0 : vector<1x4x256xf32> to vector<4x256xf32>
    %cst = arith.constant dense<0.000000e+00> : vector<256xf32>
    %2 = vector.multi_reduction <add>, %1, %cst [0] : vector<4x256xf32> to vector<256xf32>
    %3 = vector.shape_cast %2 : vector<256xf32> to vector<1x256xf32>
    %cst_2 = arith.constant 4.000000e+00 : f32
    %4 = vector.broadcast %cst_2 : f32 to vector<1x256xf32>
    %5 = arith.divf %3, %4 : vector<1x256xf32>
    %6 = vector.broadcast %5 : vector<1x256xf32> to vector<4x256xf32>
    %7 = arith.subf %1, %6 : vector<4x256xf32>
    %8 = arith.mulf %7, %7 : vector<4x256xf32>
    %cst_3 = arith.constant dense<0.000000e+00> : vector<256xf32>
    %9 = vector.multi_reduction <add>, %8, %cst_3 [0] : vector<4x256xf32> to vector<256xf32>
    %10 = vector.shape_cast %9 : vector<256xf32> to vector<1x256xf32>
    %cst_4 = arith.constant 4.000000e+00 : f32
    %11 = vector.broadcast %cst_4 : f32 to vector<1x256xf32>
    %12 = arith.divf %10, %11 : vector<1x256xf32>
    %cst_5 = arith.constant 9.99999974E-6 : f32
    %13 = vector.broadcast %cst_5 : f32 to vector<1x256xf32>
    %14 = arith.addf %12, %13 : vector<1x256xf32>
    %15 = math.rsqrt %14 : vector<1x256xf32>
    %c0_6 = arith.constant 0 : index
    %c0_7 = arith.constant 0 : index
    %16 = vector.load %arg2[%c0_6, %c0_7] : memref<4x1xf32, #tpu.memory_space<vmem>>, vector<4x1xf32>
    %17 = vector.broadcast %15 : vector<1x256xf32> to vector<4x256xf32>
    %18 = arith.mulf %7, %17 : vector<4x256xf32>
    %19 = vector.broadcast %16 : vector<4x1xf32> to vector<4x256xf32>
    %20 = arith.mulf %18, %19 : vector<4x256xf32>
    %c0_8 = arith.constant 0 : index
    %c0_9 = arith.constant 0 : index
    %21 = vector.load %arg3[%c0_8, %c0_9] : memref<4x1xf32, #tpu.memory_space<vmem>>, vector<4x1xf32>
    %22 = vector.broadcast %21 : vector<4x1xf32> to vector<4x256xf32>
    %23 = arith.addf %20, %22 : vector<4x256xf32>
    %c0_10 = arith.constant 0 : index
    %c0_11 = arith.constant 0 : index
    %c0_12 = arith.constant 0 : index
    %24 = vector.load %arg5[%c0_10, %c0_11, %c0_12] : memref<1x4x256xf32, #tpu.memory_space<vmem>>, vector<1x4x256xf32>
    %25 = vector.shape_cast %24 : vector<1x4x256xf32> to vector<4x256xf32>
    %26 = vector.shape_cast %23 : vector<4x256xf32> to vector<1x4x256xf32>
    tpu.vector_store %arg5[%c0_10, %c0_11, %c0_12], %26 {strides = array<i32>} : memref<1x4x256xf32, #tpu.memory_space<vmem>>, vector<1x4x256xf32>,
    return
  }
  func.func @transform_0(%arg0: i32, %arg1: i32) -> (i32, i32) {
    %c0_i32 = arith.constant 0 : i32
    %c0_i32_0 = arith.constant 0 : i32
    %c0_i32_1 = arith.constant 0 : i32
    return %c0_i32, %c0_i32_0 : i32, i32
  }
  func.func @transform_1(%arg0: i32, %arg1: i32) -> (i32, i32) {
    %c0_i32 = arith.constant 0 : i32
    %c0_i32_0 = arith.constant 0 : i32
    %c0_i32_1 = arith.constant 0 : i32
    return %c0_i32, %c0_i32_0 : i32, i32
  }
  func.func @transform_2(%arg0: i32, %arg1: i32) -> (i32, i32, i32) {
    %c0_i32 = arith.constant 0 : i32
    %c0_i32_0 = arith.constant 0 : i32
    return %arg0, %c0_i32, %arg1 : i32, i32, i32
  }
  func.func @transform_3(%arg0: i32, %arg1: i32) -> (i32, i32, i32) {
    %c0_i32 = arith.constant 0 : i32
    %c0_i32_0 = arith.constant 0 : i32
    return %arg0, %c0_i32, %arg1 : i32, i32, i32
  }
}

</mosaic_0001>

<bundles_post_ra>
// kernel: tpu_custom_call.1
= control target key start
LH: loop header
LB: loop body
LE: loop exit
PB: predicated region body
PF: predicated region fallthrough
CT: control target
= control target key end

     0   :  { %8 = vsyncpa [#allocation3], 0  ;;  %s681_s0 = inlined_call_operand.vmem [shape: f32[4,1], index: 0, kind: input, shape index: {}]   ;;  %s682_s1 = inlined_call_operand.vmem [shape: f32[4,1], index: 1, kind: input, shape index: {}]   ;;  %s683_s2 = inlined_call_operand.vmem [shape: f32[2,4,256], index: 2, kind: input, shape index: {}]   ;;  %s684_s3 = inlined_call_operand.hbm [shape: f32[2,4,256], index: 3, kind: output, shape index: {}]  }
   0x1   :  { %10 = vsyncpa [#allocation3 + $0x1], 0  ;;  %s559_s12 = smov 0   ;;  %s561_s13 = smov 0  }
   0x2   :  { %s563_s14 = smov 0   ;;  %s565_s15 = smov 0  }
   0x3   :  { %s567_s16 = smov 0   ;;  %s569_s17 = smov 0  }
   0x4 LB: > { %s378_s18 = sadd.s32 4294967295, %s534_s17   ;;  %s379_s19 = sadd.s32 4294967294, %s534_s17   ;;  %s534_s17 = sphi %s569_s17, %s16_s17   ;;  %s530_s16 = sphi %s567_s16, %s691_s16   ;;  %s526_s15 = sphi %s565_s15, %s690_s15   ;;  %s522_s14 = sphi %s563_s14, %s689_s14   ;;  %s518_s13 = sphi %s561_s13, %s688_s13   ;;  %s514_s12 = sphi %s559_s12, %s687_s12  }
   0x5   : > { %s28_s20 = sadd.s32 1, %s530_s16  ;;  %s107_s21 = sadd.s32 1, %s522_s14 }
   0x6   : > { %p30_p0 = scmp.ge.s32.totalorder %s28_s20, 2  ;;  %p117_p1 = scmp.ne.s32.totalorder %s522_s14, %s518_s13 }
   0x7   : > { %p118_p2 = scmp.eq.s32.totalorder %s378_s18, 1  ;;  %p123_p3 = scmp.ne.s32.totalorder %s518_s13, %s514_s12 }
   0x8   : > { %s693_s20 = smov (%p30_p0, %s28_s20), 0  ;;  %p124_p5 = scmp.eq.s32.totalorder %s379_s19, 1 }
   0x9   : > { %p599_p4 = por %p118_p2, %p117_p1  ;;  %s102_s23 = ssub.s32 %s530_s16, %s693_s20 }
   0xa   : > { %p382_p6 = scmp.ge.s32.totalorder %s534_s17, 1  ;;  %p105_p7 = scmp.eq.s32.totalorder %s102_s23, 0 }
   0xb   : > { %p606_p8 = por %p124_p5, %p123_p3  ;;  %p161_p9 = scmp.lt.s32.totalorder %s534_s17, 3 }
   0xc   : > { %s612_s25 = scalar_select %p105_p7, %s522_s14, %s107_s21  }
   0xd   : > { %p162_p10 = pnand %p382_p6, %p161_p9 }
   0xe   : > { %v251_v0 = vld [vmem:[%s681_s0] sm:$0xf] (!%p162_p10)  ;;  %v536_v1 = vmov (!%p162_p10), 0   ;;  %p190_p11 = scmp.lt.s32.totalorder (!%p162_p10), %s526_s15, 1  ;;  %vm204_vm0 = vcmask (!%p162_p10), 1043456   ;;  %v264_v45 = vlaneseq (!%p162_p10)  ;;  %s186_s8 = sand.u32 (!%p162_p10), 1, %s518_s13  }
   0xf   : > { %165 = sbr.rel (%p162_p10) target bundleno = 166 (0xa6), region = 32  ;;  %450 = vset.pattern.permute.xlu0 (!%p162_p10), %v536_v1  ;;  %v270_v2 = vld [vmem:[%s682_s1] sm:$0xf] (!%p162_p10)  ;;  %v537_v43 = vmov (!%p162_p10), 839922192   ;;  %s383_s9 = sshll.u32 (!%p162_p10), %s186_s8, 3 }
  0x10   : > { %259 = vperm.xlu0 (!%p162_p10), %450, %v251_v0   ;;  %v262_v44 = vunpack.c.l.s4 (!%p162_p10), %v537_v43  ;;  %v265_v48 = vshrl.u32 (!%p162_p10), %v264_v45, 7  ;;  %s392_s10 = sshll.u32 (!%p162_p10), %s526_s15, 7  ;;  %s188_s11 = scalar_lea.vmem (!%p162_p10), [#allocation2], %s383_s9 }
  0x11   : > { %s302_s18 = sshll.u32 (!%p162_p10), %s188_s11, 4  ;;  %s634_s23 = scalar_lea.hbm (!%p162_p10), %s684_s3, %s392_s10  ;;  %s636_s18 = int_to_ptr.vmem [resolvable:$true] %s302_s18 }
  0x12   : > { %v263_v47 = vunpack.c.0.s8 (!%p162_p10), %v262_v44  ;;  %s286_s26 = scalar_lea.sflag (!%p162_p10), [#allocation3], %s186_s8  ;;  %s456_s27 = scalar_lea.vmem (!%p162_p10), %s636_s18, 128 }
  0x13   : > { %p457_p12 = scmp.ne.s32.totalorder (!%p162_p10), %s636_s18, %s456_s27 }
  0x14   : > { %273 = vperm.xlu0 (!%p162_p10), %450, %v270_v2   ;;  %v266_v50 = vsub.s32 (!%p162_p10), %v263_v47, %v265_v48 }
  0x15   : > { %p458_p13 = pnand (!%p162_p10), %p457_p12, %p599_p4 }
  0x16   : > { %s191_s30 = scalar_select %p190_p11, %s526_s15, 1 }
  0x17   : > { %p459_p0 = pneg %p458_p13  ;;  %s538_s15 = smov [#allocation2]  }
  0x18   : > { %s391_s4 = sshll.u32 %s191_s30, 3  ;;  %s460_s28 = sshll.u32 %s538_s15, 4  ;;  %s461_s28 = int_to_ptr.vmem [resolvable:$false] %s460_s28 }
  0x19   : > { %s197_s7 = scalar_lea.vmem %s683_s2, %s391_s4  ;;  %s462_s29 = scalar_lea.vmem %s461_s28, 256 }
  0x1a   : > { %v200_v3 = vld [vmem:[%s197_s7] sm:$0xff]  ;;  %p463_p1 = scmp.lt.s32.totalorder %s636_s18, %s461_s28  ;;  %p464_p2 = scmp.lt.s32.totalorder %s462_s29, %s456_s27 }
  0x1b   : > { %v202_v4 = vcombine.high %v200_v3, %v200_v3  ;;  %v205_v5 = vsel %vm204_vm0, %v200_v3, 0.0 }
  0x1c   : > { %v206_v7 = vrot.slane %v205_v5, 4  ;;  %p465_p3 = por %p464_p2, %p463_p1 }
  0x1d   : > { %v212_v6 = vsel %vm204_vm0, %v202_v4, 0.0 }
  0x1e   : > { %v213_v8 = vrot.slane %v212_v6, 4  ;;  %v207_v9 = vadd.f32 %v206_v7, %v205_v5  ;;  %p466_p5 = pnand %p465_p3, %p459_p0 }
  0x20   : > { %v214_v10 = vadd.f32 %v213_v8, %v212_v6  ;;  %v208_v11 = vrot.slane %v207_v9, 2 }
  0x22   : > { %v215_v12 = vrot.slane %v214_v10, 2  ;;  %v209_v13 = vadd.f32 %v208_v11, %v207_v9 }
  0x24   : > { %v216_v14 = vadd.f32 %v215_v12, %v214_v10  ;;  %v210_v15 = vrot.slane %v209_v13, 1 }
  0x26   : > { %v217_v16 = vrot.slane %v216_v14, 1  ;;  %v211_v17 = vadd.f32 %v210_v15, %v209_v13 }
  0x28   : > { %v218_v18 = vadd.f32 %v217_v16, %v216_v14  ;;  %v220_v19 = vmul.f32 0.25, %v211_v17 }
  0x2a   : > { %v221_v20 = vmul.f32 0.25, %v218_v18 }
  0x2c   : > { %v224_v21 = vcombine.low %v220_v19, %v221_v20 }
  0x2e   : > { %v226_v22 = vsub.f32 %v200_v3, %v224_v21 }
  0x30   : > { %v227_v23 = vmul.f32 %v226_v22, %v226_v22 }
  0x32   : > { %v229_v24 = vcombine.high %v227_v23, %v227_v23  ;;  %v231_v25 = vsel %vm204_vm0, %v227_v23, 0.0 }
  0x33   : > { %v232_v27 = vrot.slane %v231_v25, 4 }
  0x34   : > { %v238_v26 = vsel %vm204_vm0, %v229_v24, 0.0 }
  0x35   : > { %v239_v28 = vrot.slane %v238_v26, 4  ;;  %v233_v29 = vadd.f32 %v232_v27, %v231_v25 }
  0x37   : > { %v240_v30 = vadd.f32 %v239_v28, %v238_v26  ;;  %v234_v31 = vrot.slane %v233_v29, 2 }
  0x39   : > { %v241_v32 = vrot.slane %v240_v30, 2  ;;  %v235_v33 = vadd.f32 %v234_v31, %v233_v29 }
  0x3b   : > { %v242_v34 = vadd.f32 %v241_v32, %v240_v30  ;;  %v236_v35 = vrot.slane %v235_v33, 1 }
  0x3d   : > { %v243_v36 = vrot.slane %v242_v34, 1  ;;  %v237_v37 = vadd.f32 %v236_v35, %v235_v33 }
  0x3f   : > { %v244_v38 = vadd.f32 %v243_v36, %v242_v34  ;;  %v245_v39 = vmul.f32 0.25, %v237_v37 }
  0x41   : > { %v246_v40 = vmul.f32 0.25, %v244_v38  ;;  %v247_v41 = vadd.f32 1e-05, %v245_v39 }
  0x43   : > { %v248_v42 = vadd.f32 1e-05, %v246_v40  ;;  %452 = vrsqrt.f32 %v247_v41 }
  0x45   : > { %454 = vrsqrt.f32 %v248_v42 }
  0x4d   : > { %v453_v46 = vpop.eup %452 }
  0x4f   : > { %v455_v49 = vpop.eup %454 }
  0x50   : > { %v254_v51 = vcombine.low %v453_v46, %v455_v49 }
  0x52   : > { %v256_v53 = vmul.f32 %v254_v51, %v226_v22 }
  0x8f   : > { %v260_v52 = vpop.permute.xlu0 %259 }
  0x90   : > { %v267_v54 = vrot.slane %v260_v52, %v266_v50 }
  0x92   : > { %v269_v56 = vmul.f32 %v267_v54, %v256_v53 }
  0x93   : > { %v274_v55 = vpop.permute.xlu0 %273 }
  0x94   : > { %v281_v57 = vrot.slane %v274_v55, %v266_v50 }
  0x96   : > { %v283_v58 = vadd.f32 %v281_v57, %v269_v56 }
  0x98   : > { %284 = vst [vmem:[%s188_s11] sm:$0xff] %v283_v58 }
  0x99   : > { %469 = shalt.err (!%p466_p5)
}
  0x9a   : > { %s470_s30 = scalar_lea.hbm %s634_s23, 128  ;;  %s474_s6 = scalar_lea.hbm %s684_s3, 256 }
  0x9b   : > { %p471_p6 = scmp.ne.s32.totalorder %s634_s23, %s470_s30  ;;  %p475_p10 = scmp.lt.u32.totalorder %s634_s23, %s684_s3 }
  0x9c   : > { %p476_p11 = scmp.lt.u32.totalorder %s474_s6, %s470_s30  ;;  %p478_p13 = scmp.lt.u32.totalorder %s470_s30, %s634_s23 }
  0x9d   : > { %p472_p7 = pnand %p471_p6, %p599_p4 }
  0x9e   : > { %p477_p12 = por %p476_p11, %p475_p10 }
  0x9f   : > { %p473_p9 = pneg %p472_p7 }
  0xa0   : > { %p479_p0 = por %p478_p13, %p477_p12 }
  0xa2   : > { %p480_p1 = pnand %p479_p0, %p473_p9 }
  0xa4   : > { %483 = shalt.err (!%p480_p1)
}
  0xa5   : > { %393 = dma.vmem_to_hbm [thread:$0]  (%p599_p4), %s636_s18, 128, %s634_s23, %s286_s26  }
  0xa6 PF: > { %p399_p2 = scmp.ge.s32.totalorder %s534_s17, 2  ;;  %s314_s9 = sand.u32 1, %s514_s12  }
  0xa7   : > { %s315_s10 = scalar_lea.sflag [#allocation3], %s314_s9 }
  0xa8   : > { %p396_p3 = pnand %p399_p2, %p606_p8 }
  0xaa   : > { %509 = dma.done.wait (!%p396_p3), %s315_s10, 128  }
  0xab   : > { %511 = vsyncadd (!%p396_p3), %s315_s10, 4294967168  ;;  %s16_s17 = sadd.s32 1, %s534_s17   ;;  %s687_s12 = smov %s518_s13 }
  0xac   : > { %p13_p5 = scmp.ge.s32.totalorder %s16_s17, 4   ;;  %s688_s13 = smov %s522_s14 }
  0xad   : > { %s689_s14 = smov %s612_s25  ;;  %s690_s15 = smov %s530_s16 }
  0xae   : > { %s691_s16 = smov %s693_s20  ;;  %15 = sbr.rel (!%p13_p5) target bundleno = 4 (0x4), region = 67 }
  0xb5   :  { %320 = vsyncpa [#allocation3], 1 }
  0xb6   :  { %322 = vsyncpa [#allocation3 + $0x1], 1 }

</bundles_post_ra>
